<compile_context>
chip_gen: v7x
topology: tpu7x:2x2x1
jax: 0.10.0
libtpu: 0.0.40
codegen_flags: <defaults>
</compile_context>

<pallas_src>
import functools
import math

import jax
import jax.numpy as jnp
from jax.experimental import pallas as pl
from jax.experimental.pallas import tpu as pltpu


def _round_up(x, m):
    return (x + m - 1) // m * m


# ----------------------------------------------------------------------------
# Fused kernel: all layers in one body. refs = (x, w1, b1, w2, b2, ..., out).
# Intermediate activations are plain values (VMEM/vreg resident).
# ----------------------------------------------------------------------------
def _fused_mlp_kernel(*refs, activation, out_valid):
    x_ref = refs[0]
    o_ref = refs[-1]
    wb = refs[1:-1]
    num_layers = len(wb) // 2

    x = x_ref[...]
    for li in range(num_layers):
        w = wb[2 * li][...]
        b = wb[2 * li + 1][...]
        z = jnp.dot(x, w, preferred_element_type=jnp.float32) + b  # (tm, Np)

        if li < num_layers - 1:
            if activation == "relu":
                x = jnp.maximum(z, 0.0)
            elif activation == "sigmoid":
                x = jax.nn.sigmoid(z)          # EUP
            elif activation == "tanh":
                x = jnp.tanh(z)                # EUP
            else:
                raise ValueError(f"unknown activation {activation!r}")
        else:
            # log_softmax over dim=1; padded lanes must not contribute to the
            # max / sum, so push them to a huge negative value first.
            lane = jax.lax.broadcasted_iota(jnp.int32, z.shape, dimension=1)
            z = jnp.where(lane < out_valid, z, jnp.float32(-1e30))
            m = jnp.max(z, axis=1, keepdims=True)          # XLU reduction
            shifted = z - m
            lse = jnp.log(jnp.sum(jnp.exp(shifted), axis=1, keepdims=True))
            x = shifted - lse

    o_ref[...] = x


# ----------------------------------------------------------------------------
# Wrapper: pad to lane/sublane-aligned shapes, build specs, run one kernel.
# ----------------------------------------------------------------------------
def mlp_forward_pallas(x, params, act_fn="relu"):
    """Forward pass matching MLP.forward: hidden Linear+act, final Linear+log_softmax."""
    B, K = x.shape
    sizes = [K] + [w_t.shape[1] for (w_t, _) in params]   # per-layer feature sizes
    out_size = sizes[-1]
    num_layers = len(params)

    # Lane-dense padding of feature dims; sublane-aligned batch tiling.
    p_sizes = [_round_up(s, 128) for s in sizes]
    tm = min(256, _round_up(B, 8))
    Bp = _round_up(B, tm)

    xp = jnp.pad(x, ((0, Bp - B), (0, p_sizes[0] - K)))

    padded = []
    for li, (w_t, b) in enumerate(params):
        kin, kout = w_t.shape
        wp = jnp.pad(w_t, ((0, p_sizes[li] - kin), (0, p_sizes[li + 1] - kout)))
        bp = jnp.pad(b.reshape(1, -1), ((0, 0), (0, p_sizes[li + 1] - kout)))
        padded.append((wp, bp))

    kernel = functools.partial(
        _fused_mlp_kernel, activation=act_fn, out_valid=out_size
    )

    in_specs = [pl.BlockSpec((tm, p_sizes[0]), lambda i: (i, 0))]
    flat_inputs = [xp]
    for wp, bp in padded:
        in_specs.append(pl.BlockSpec(wp.shape, lambda i: (0, 0)))
        in_specs.append(pl.BlockSpec(bp.shape, lambda i: (0, 0)))
        flat_inputs.extend([wp, bp])

    out_p = p_sizes[-1]

    # Advisory cost estimate for XLA's scheduler.
    flops = sum(2 * Bp * p_sizes[li] * p_sizes[li + 1] for li in range(num_layers))
    trans_per_act = {"relu": 0, "sigmoid": 1, "tanh": 1}[act_fn]
    transcendentals = Bp * out_p + trans_per_act * sum(
        Bp * p_sizes[li + 1] for li in range(num_layers - 1)
    )
    bytes_accessed = 4 * (
        Bp * p_sizes[0]
        + sum(wp.size + bp.size for wp, bp in padded)
        + Bp * out_p
    )

    out = pl.pallas_call(
        kernel,
        out_shape=jax.ShapeDtypeStruct((Bp, out_p), jnp.float32),
        grid=(Bp // tm,),
        in_specs=in_specs,
        out_specs=pl.BlockSpec((tm, out_p), lambda i: (i, 0)),
        compiler_params=pltpu.CompilerParams(
            dimension_semantics=("parallel",)
        ),
        cost_estimate=pl.CostEstimate(
            flops=flops,
            transcendentals=transcendentals,
            bytes_accessed=bytes_accessed,
        ),
    )(*flat_inputs)

    return out[:B, :out_size]


# ----------------------------------------------------------------------------
# Parameter construction (deterministic, mirrors MLP.parameters_init).
# ----------------------------------------------------------------------------
def init_mlp_params(key, inp_size, h_sizes, out_size, init_type="glorot"):
    sizes = [inp_size] + list(h_sizes) + [out_size]
    params = []
    for fan_in, fan_out in zip(sizes[:-1], sizes[1:]):
        key, wkey = jax.random.split(key)
        if init_type == "zero":
            w = jnp.zeros((fan_out, fan_in), jnp.float32)
        elif init_type == "normal":
            w = jax.random.normal(wkey, (fan_out, fan_in), jnp.float32)
        elif init_type == "glorot":
            bound = math.sqrt(6.0 / (fan_in + fan_out))
            w = jax.random.uniform(
                wkey, (fan_out, fan_in), jnp.float32, -bound, bound
            )
        elif init_type == "default":
            stdv = 1.0 / math.sqrt(fan_in)
            w = jax.random.uniform(
                wkey, (fan_out, fan_in), jnp.float32, -stdv, stdv
            )
        else:
            raise ValueError(init_type)
        b = jnp.zeros((fan_out,), jnp.float32)   # nn.init.constant(bias, 0)
        params.append((w.T, b))                  # store transposed (in, out)
    return params


# ----------------------------------------------------------------------------
# Pure-JAX reference (for correctness checking only).
# ----------------------------------------------------------------------------
def mlp_reference(x, params, act_fn="relu"):
    acts = {
        "relu": lambda v: jnp.maximum(v, 0.0),
        "sigmoid": jax.nn.sigmoid,
        "tanh": jnp.tanh,
    }
    a = acts[act_fn]
    for w_t, b in params[:-1]:
        x = a(x @ w_t + b)
    w_t, b = params[-1]
    return jax.nn.log_softmax(x @ w_t + b, axis=1)


if __name__ == "__main__":
    key = jax.random.PRNGKey(0)
    k_x, k_p = jax.random.split(key)

    # Small config consistent with the module's constructor signature.
    batch = 8
    inp_size = 32
    h_sizes = [64, 32]
    out_size = 16
    act_fn = "relu"
    init_type = "glorot"

    x = jax.random.normal(k_x, (batch, inp_size), jnp.float32)
    params = init_mlp_params(k_p, inp_size, h_sizes, out_size, init_type)

    out = mlp_forward_pallas(x, params, act_fn)
    out = jax.block_until_ready(out)

    # Correctness checks against a pure-JAX reference and log_softmax property.
    ref = mlp_reference(x, params, act_fn)
    assert out.shape == (batch, out_size)
    assert bool(jnp.all(jnp.abs(out - ref) < 1e-4)), "mismatch vs reference"
    row_sums = jnp.sum(jnp.exp(out), axis=1)
    assert bool(jnp.all(jnp.abs(row_sums - 1.0) < 1e-4))

    print("KERNEL_OK")
</pallas_src>

<mosaic_0001>
module attributes {stable_mosaic.version = 11 : i64} {
  func.func @_fused_mlp_kernel(%arg0: i32, %arg1: memref<8x128xf32, #tpu.memory_space<vmem>>, %arg2: memref<128x128xf32, #tpu.memory_space<vmem>>, %arg3: memref<1x128xf32, #tpu.memory_space<vmem>>, %arg4: memref<128x128xf32, #tpu.memory_space<vmem>>, %arg5: memref<1x128xf32, #tpu.memory_space<vmem>>, %arg6: memref<128x128xf32, #tpu.memory_space<vmem>>, %arg7: memref<1x128xf32, #tpu.memory_space<vmem>>, %arg8: memref<8x128xf32, #tpu.memory_space<vmem>>) attributes {dimension_semantics = [#tpu.dimension_semantics<parallel>], iteration_bounds = array<i64: 1>, scalar_prefetch = 0 : i64, scratch_operands = 0 : i64, tpu.core_type = #tpu.core_type<tc>, window_params = [{transform_indices = @transform_0, window_bounds = array<i64: 8, 128>}, {pipeline_mode = #tpu.pipeline_mode<synchronous>, transform_indices = @transform_1, window_bounds = array<i64: 128, 128>}, {pipeline_mode = #tpu.pipeline_mode<synchronous>, transform_indices = @transform_2, window_bounds = array<i64: 1, 128>}, {pipeline_mode = #tpu.pipeline_mode<synchronous>, transform_indices = @transform_3, window_bounds = array<i64: 128, 128>}, {pipeline_mode = #tpu.pipeline_mode<synchronous>, transform_indices = @transform_4, window_bounds = array<i64: 1, 128>}, {pipeline_mode = #tpu.pipeline_mode<synchronous>, transform_indices = @transform_5, window_bounds = array<i64: 128, 128>}, {pipeline_mode = #tpu.pipeline_mode<synchronous>, transform_indices = @transform_6, window_bounds = array<i64: 1, 128>}, {transform_indices = @transform_7, window_bounds = array<i64: 8, 128>}]} {
    %c0 = arith.constant 0 : index
    %c0_0 = arith.constant 0 : index
    %0 = vector.load %arg1[%c0, %c0_0] : memref<8x128xf32, #tpu.memory_space<vmem>>, vector<8x128xf32>
    %c0_1 = arith.constant 0 : index
    %c0_2 = arith.constant 0 : index
    %1 = vector.load %arg2[%c0_1, %c0_2] : memref<128x128xf32, #tpu.memory_space<vmem>>, vector<128x128xf32>
    %c0_3 = arith.constant 0 : index
    %c0_4 = arith.constant 0 : index
    %2 = vector.load %arg3[%c0_3, %c0_4] : memref<1x128xf32, #tpu.memory_space<vmem>>, vector<1x128xf32>
    %cst = arith.constant dense<0.000000e+00> : vector<8x128xf32>
    %3 = tpu.matmul %0, %1, %cst {dimension_numbers = #tpu.dot_dimension_numbers<[1], [0], [0], [1], [0, 0, 1, 1], [], []>} : vector<8x128xf32>, vector<128x128xf32>, vector<8x128xf32> -> vector<8x128xf32>
    %4 = vector.broadcast %2 : vector<1x128xf32> to vector<8x128xf32>
    %5 = arith.addf %3, %4 : vector<8x128xf32>
    %cst_5 = arith.constant 0.000000e+00 : f32
    %6 = vector.broadcast %cst_5 : f32 to vector<8x128xf32>
    %7 = arith.maximumf %5, %6 : vector<8x128xf32>
    %c0_6 = arith.constant 0 : index
    %c0_7 = arith.constant 0 : index
    %8 = vector.load %arg4[%c0_6, %c0_7] : memref<128x128xf32, #tpu.memory_space<vmem>>, vector<128x128xf32>
    %c0_8 = arith.constant 0 : index
    %c0_9 = arith.constant 0 : index
    %9 = vector.load %arg5[%c0_8, %c0_9] : memref<1x128xf32, #tpu.memory_space<vmem>>, vector<1x128xf32>
    %cst_10 = arith.constant dense<0.000000e+00> : vector<8x128xf32>
    %10 = tpu.matmul %7, %8, %cst_10 {dimension_numbers = #tpu.dot_dimension_numbers<[1], [0], [0], [1], [0, 0, 1, 1], [], []>} : vector<8x128xf32>, vector<128x128xf32>, vector<8x128xf32> -> vector<8x128xf32>
    %11 = vector.broadcast %9 : vector<1x128xf32> to vector<8x128xf32>
    %12 = arith.addf %10, %11 : vector<8x128xf32>
    %cst_11 = arith.constant 0.000000e+00 : f32
    %13 = vector.broadcast %cst_11 : f32 to vector<8x128xf32>
    %14 = arith.maximumf %12, %13 : vector<8x128xf32>
    %c0_12 = arith.constant 0 : index
    %c0_13 = arith.constant 0 : index
    %15 = vector.load %arg6[%c0_12, %c0_13] : memref<128x128xf32, #tpu.memory_space<vmem>>, vector<128x128xf32>
    %c0_14 = arith.constant 0 : index
    %c0_15 = arith.constant 0 : index
    %16 = vector.load %arg7[%c0_14, %c0_15] : memref<1x128xf32, #tpu.memory_space<vmem>>, vector<1x128xf32>
    %cst_16 = arith.constant dense<0.000000e+00> : vector<8x128xf32>
    %17 = tpu.matmul %14, %15, %cst_16 {dimension_numbers = #tpu.dot_dimension_numbers<[1], [0], [0], [1], [0, 0, 1, 1], [], []>} : vector<8x128xf32>, vector<128x128xf32>, vector<8x128xf32> -> vector<8x128xf32>
    %18 = vector.broadcast %16 : vector<1x128xf32> to vector<8x128xf32>
    %19 = arith.addf %17, %18 : vector<8x128xf32>
    %20 = tpu.iota {dimensions = array<i32: 1>} : vector<8x128xi32>
    %c16_i32 = arith.constant 16 : i32
    %21 = vector.broadcast %c16_i32 : i32 to vector<8x128xi32>
    %22 = arith.cmpi slt, %20, %21 : vector<8x128xi32>
    %cst_17 = arith.constant -1.000000e+30 : f32
    %23 = vector.broadcast %cst_17 : f32 to vector<8x128xf32>
    %24 = arith.select %22, %19, %23 : vector<8x128xi1>, vector<8x128xf32>
    %cst_18 = arith.constant dense<0xFF800000> : vector<8xf32>
    %25 = vector.multi_reduction <maximumf>, %24, %cst_18 [1] : vector<8x128xf32> to vector<8xf32>
    %26 = vector.shape_cast %25 : vector<8xf32> to vector<8x1xf32>
    %27 = vector.broadcast %26 : vector<8x1xf32> to vector<8x128xf32>
    %28 = arith.subf %24, %27 : vector<8x128xf32>
    %29 = math.exp %28 : vector<8x128xf32>
    %cst_19 = arith.constant dense<0.000000e+00> : vector<8xf32>
    %30 = vector.multi_reduction <add>, %29, %cst_19 [1] : vector<8x128xf32> to vector<8xf32>
    %31 = vector.shape_cast %30 : vector<8xf32> to vector<8x1xf32>
    %32 = math.log %31 : vector<8x1xf32>
    %33 = vector.broadcast %32 : vector<8x1xf32> to vector<8x128xf32>
    %34 = arith.subf %28, %33 : vector<8x128xf32>
    %c0_20 = arith.constant 0 : index
    %c0_21 = arith.constant 0 : index
    %35 = vector.load %arg8[%c0_20, %c0_21] : memref<8x128xf32, #tpu.memory_space<vmem>>, vector<8x128xf32>
    tpu.vector_store %arg8[%c0_20, %c0_21], %34 {strides = array<i32>} : memref<8x128xf32, #tpu.memory_space<vmem>>, vector<8x128xf32>,
    return
  }
  func.func @transform_0(%arg0: i32) -> (i32, i32) {
    %c0_i32 = arith.constant 0 : i32
    %c0_i32_0 = arith.constant 0 : i32
    return %arg0, %c0_i32 : i32, i32
  }
  func.func @transform_1(%arg0: i32) -> (i32, i32) {
    %c0_i32 = arith.constant 0 : i32
    %c0_i32_0 = arith.constant 0 : i32
    %c0_i32_1 = arith.constant 0 : i32
    return %c0_i32, %c0_i32_0 : i32, i32
  }
  func.func @transform_2(%arg0: i32) -> (i32, i32) {
    %c0_i32 = arith.constant 0 : i32
    %c0_i32_0 = arith.constant 0 : i32
    %c0_i32_1 = arith.constant 0 : i32
    return %c0_i32, %c0_i32_0 : i32, i32
  }
  func.func @transform_3(%arg0: i32) -> (i32, i32) {
    %c0_i32 = arith.constant 0 : i32
    %c0_i32_0 = arith.constant 0 : i32
    %c0_i32_1 = arith.constant 0 : i32
    return %c0_i32, %c0_i32_0 : i32, i32
  }
  func.func @transform_4(%arg0: i32) -> (i32, i32) {
    %c0_i32 = arith.constant 0 : i32
    %c0_i32_0 = arith.constant 0 : i32
    %c0_i32_1 = arith.constant 0 : i32
    return %c0_i32, %c0_i32_0 : i32, i32
  }
  func.func @transform_5(%arg0: i32) -> (i32, i32) {
    %c0_i32 = arith.constant 0 : i32
    %c0_i32_0 = arith.constant 0 : i32
    %c0_i32_1 = arith.constant 0 : i32
    return %c0_i32, %c0_i32_0 : i32, i32
  }
  func.func @transform_6(%arg0: i32) -> (i32, i32) {
    %c0_i32 = arith.constant 0 : i32
    %c0_i32_0 = arith.constant 0 : i32
    %c0_i32_1 = arith.constant 0 : i32
    return %c0_i32, %c0_i32_0 : i32, i32
  }
  func.func @transform_7(%arg0: i32) -> (i32, i32) {
    %c0_i32 = arith.constant 0 : i32
    %c0_i32_0 = arith.constant 0 : i32
    return %arg0, %c0_i32 : i32, i32
  }
}

</mosaic_0001>

<bundles_post_ra>
// kernel: tpu_custom_call.1
= control target key start
LH: loop header
LB: loop body
LE: loop exit
PB: predicated region body
PF: predicated region fallthrough
CT: control target
= control target key end

     0   :  { %12 = vsyncpa [#allocation3], 0  ;;  %s915_s0 = inlined_call_operand.hbm [shape: f32[8,128], index: 0, kind: input, shape index: {}]   ;;  %s916_s1 = inlined_call_operand.hbm [shape: f32[128,128], index: 1, kind: input, shape index: {}]   ;;  %s917_s2 = inlined_call_operand.vmem [shape: f32[1,128], index: 2, kind: input, shape index: {}]   ;;  %s918_s3 = inlined_call_operand.hbm [shape: f32[128,128], index: 3, kind: input, shape index: {}]   ;;  %s919_s4 = inlined_call_operand.vmem [shape: f32[1,128], index: 4, kind: input, shape index: {}]   ;;  %s920_s5 = inlined_call_operand.hbm [shape: f32[128,128], index: 5, kind: input, shape index: {}]   ;;  %s921_s6 = inlined_call_operand.vmem [shape: f32[1,128], index: 6, kind: input, shape index: {}]   ;;  %s922_s7 = inlined_call_operand.hbm [shape: f32[8,128], index: 7, kind: output, shape index: {}]  }
   0x1   :  { %13 = vsyncpa [#allocation6], 0 }
   0x2   :  { %14 = vsyncpa [#allocation9], 0 }
   0x3   :  { %15 = vsyncpa [#allocation4], 0  ;;  %s757_s24 = smov [#allocation5]   ;;  %s639_s28 = scalar_lea.hbm %s916_s1, 2048 }
   0x4   :  { %s31_s25 = sshll.u32 %s757_s24, 4  ;;  %p640_p0 = scmp.ne.s32.totalorder %s916_s1, %s639_s28  ;;  %s32_s25 = int_to_ptr.vmem [resolvable:$true] %s31_s25 }
   0x5   :  { %p643_p1 = scmp.lt.u32.totalorder %s639_s28, %s916_s1 }
   0x7   :  { %p645_p2 = pnand %p643_p1, %p640_p0 }
   0x9   :  { %648 = shalt.err (!%p645_p2)
}
   0xa   :  { %s649_s10 = scalar_lea.vmem %s32_s25, 2048  ;;  %p654_p4 = scmp.lt.s32.totalorder %s32_s25, %s32_s25 }
   0xb   :  { %p650_p3 = scmp.ne.s32.totalorder %s32_s25, %s649_s10  ;;  %p655_p5 = scmp.lt.s32.totalorder %s649_s10, %s649_s10 }
   0xd   :  { %p656_p6 = por %p655_p5, %p654_p4 }
   0xf   :  { %p657_p7 = pnand %p656_p6, %p650_p3 }
  0x11   :  { %660 = shalt.err (!%p657_p7)
}
  0x12   :  { %s758_s11 = smov 128   ;;  %s759_s12 = smov 8  }
  0x13   :  { %37 = dma.hbm_to_vmem [thread:$0]  %s916_s1, 2048, %s32_s25, [#allocation6], %s758_s11, %s758_s11, %s759_s12  }
  0x14   :  { %s760_s15 = smov [#allocation2]   ;;  %s761_s17 = smov [#allocation7]  }
  0x15   :  { %s22_s16 = sshll.u32 %s760_s15, 4  ;;  %s45_s18 = sshll.u32 %s761_s17, 4  ;;  %s23_s16 = int_to_ptr.vmem [resolvable:$true] %s22_s16  ;;  %s46_s18 = int_to_ptr.vmem [resolvable:$true] %s45_s18 }
  0x16   :  { %s661_s21 = scalar_lea.hbm %s915_s0, 128 }
  0x17   :  { %p662_p8 = scmp.ne.s32.totalorder %s915_s0, %s661_s21  ;;  %p665_p9 = scmp.lt.u32.totalorder %s661_s21, %s915_s0 }
  0x19   :  { %p667_p10 = pnand %p665_p9, %p662_p8 }
  0x1b   :  { %670 = shalt.err (!%p667_p10)
}
  0x1c   :  { %s671_s1 = scalar_lea.vmem %s23_s16, 128  ;;  %p676_p12 = scmp.lt.s32.totalorder %s23_s16, %s23_s16 }
  0x1d   :  { %p672_p11 = scmp.ne.s32.totalorder %s23_s16, %s671_s1  ;;  %p677_p13 = scmp.lt.s32.totalorder %s671_s1, %s671_s1 }
  0x1f   :  { %p678_p0 = por %p677_p13, %p676_p12 }
  0x21   :  { %p679_p1 = pnand %p678_p0, %p672_p11 }
  0x23   :  { %682 = shalt.err (!%p679_p1)
}
  0x24   :  { %25 = dma.hbm_to_vmem [thread:$0]  %s915_s0, 128, %s23_s16, [#allocation3]  }
  0x25   :  { %s683_s30 = scalar_lea.hbm %s918_s3, 2048 }
  0x26   :  { %p684_p2 = scmp.ne.s32.totalorder %s918_s3, %s683_s30  ;;  %p687_p3 = scmp.lt.u32.totalorder %s683_s30, %s918_s3 }
  0x28   :  { %p689_p4 = pnand %p687_p3, %p684_p2 }
  0x2a   :  { %692 = shalt.err (!%p689_p4)
}
  0x2b   :  { %s693_s14 = scalar_lea.vmem %s46_s18, 2048  ;;  %p698_p6 = scmp.lt.s32.totalorder %s46_s18, %s46_s18 }
  0x2c   :  { %p694_p5 = scmp.ne.s32.totalorder %s46_s18, %s693_s14  ;;  %p699_p7 = scmp.lt.s32.totalorder %s693_s14, %s693_s14 }
  0x2e   :  { %p700_p8 = por %p699_p7, %p698_p6 }
  0x30   :  { %p701_p9 = pnand %p700_p8, %p694_p5 }
  0x32   :  { %704 = shalt.err (!%p701_p9)
}
  0x33   :  { %51 = dma.hbm_to_vmem [thread:$0]  %s918_s3, 2048, %s46_s18, [#allocation6], %s758_s11, %s758_s11, %s759_s12  }
  0x34   :  { %s762_s16 = smov [#allocation8]   ;;  %s705_s21 = scalar_lea.hbm %s920_s5, 2048 }
  0x35   :  { %s59_s17 = sshll.u32 %s762_s16, 4  ;;  %p706_p10 = scmp.ne.s32.totalorder %s920_s5, %s705_s21  ;;  %s60_s17 = int_to_ptr.vmem [resolvable:$true] %s59_s17 }
  0x36   :  { %p709_p11 = scmp.lt.u32.totalorder %s705_s21, %s920_s5 }
  0x38   :  { %p711_p12 = pnand %p709_p11, %p706_p10 }
  0x3a   :  { %714 = shalt.err (!%p711_p12)
}
  0x3b   :  { %s715_s1 = scalar_lea.vmem %s60_s17, 2048  ;;  %p720_p0 = scmp.lt.s32.totalorder %s60_s17, %s60_s17 }
  0x3c   :  { %p716_p13 = scmp.ne.s32.totalorder %s60_s17, %s715_s1  ;;  %p721_p1 = scmp.lt.s32.totalorder %s715_s1, %s715_s1 }
  0x3e   :  { %p722_p2 = por %p721_p1, %p720_p0 }
  0x40   :  { %p723_p3 = pnand %p722_p2, %p716_p13 }
  0x42   :  { %726 = shalt.err (!%p723_p3)
}
  0x43   :  { %65 = dma.hbm_to_vmem [thread:$0]  %s920_s5, 2048, %s60_s17, [#allocation9], %s758_s11, %s758_s11, %s759_s12  }
  0x44   :  { %749 = dma.done.wait [#allocation3], 128  }
  0x45   :  { %750 = vsyncadd [#allocation3], 4294967168 }
  0x46   :  { %751 = dma.done.wait [#allocation6], 4096  }
  0x47   :  { %752 = vsyncadd [#allocation6], 4294963200 }
  0x48   :  { %753 = dma.done.wait [#allocation9], 2048  }
  0x49   :  { %754 = vsyncadd [#allocation9], 4294965248  ;;  %v763_v0 = vmov 0.0|0.0   ;;  %vm764_vm0 = vmmov 0   ;;  %v765_v1 = vmov 0.0   ;;  %v81_v2 = vld [vmem:[#allocation5] sm:$0xff] }
  0x4a   :  { %553 = vmatprep.subr.bf16.mxu0 %v763_v0  ;;  %480 = vmatprep.mubr.msk.f32.mxu0 %vm764_vm0, %v765_v1  ;;  %v82_v3 = vld [vmem:[#allocation5 + $0x8] sm:$0xff]  ;;  %v83_v4 = vld [vmem:[#allocation5 + $0x10] sm:$0xff]  ;;  %v84_v6 = vld [vmem:[#allocation5 + $0x18] sm:$0xff] }
  0x4b   :  { %577 = vmatprep.subr.bf16.mxu1 %v763_v0  ;;  %515 = vmatprep.mubr.msk.f32.mxu1 %vm764_vm0, %v765_v1  ;;  %v554_v5 = vpack.c.bf16 %v82_v3, %v81_v2  ;;  %v557_v7 = vpack.c.bf16 %v84_v6, %v83_v4  ;;  %v85_v8 = vld [vmem:[#allocation5 + $0x20] sm:$0xff]  ;;  %v86_v9 = vld [vmem:[#allocation5 + $0x28] sm:$0xff]  ;;  %v177_v12 = vld [vmem:[#allocation7 + $0x10] sm:$0xff] }
  0x4c   :  { %v175_v10 = vld [vmem:[#allocation7] sm:$0xff]  ;;  %v176_v11 = vld [vmem:[#allocation7 + $0x8] sm:$0xff]  ;;  %v178_v13 = vld [vmem:[#allocation7 + $0x18] sm:$0xff]  ;;  %v560_v14 = vpack.c.bf16 %v86_v9, %v85_v8 }
  0x4d   :  { %555 = vmatpush3.bf16.msra.mxu0 %v554_v5  ;;  %v578_v15 = vpack.c.bf16 %v176_v11, %v175_v10  ;;  %v87_v16 = vld [vmem:[#allocation5 + $0x30] sm:$0xff]  ;;  %v88_v17 = vld [vmem:[#allocation5 + $0x38] sm:$0xff]  ;;  %v581_v18 = vpack.c.bf16 %v178_v13, %v177_v12  ;;  %v179_v19 = vld [vmem:[#allocation7 + $0x20] sm:$0xff] }
  0x4e   :  { %556 = vmatprep.subr.bf16.mxu0 %v763_v0  ;;  %v180_v20 = vld [vmem:[#allocation7 + $0x28] sm:$0xff]  ;;  %v563_v21 = vpack.c.bf16 %v88_v17, %v87_v16  ;;  %v89_v22 = vld [vmem:[#allocation5 + $0x40] sm:$0xff]  ;;  %v181_v25 = vld [vmem:[#allocation7 + $0x30] sm:$0xff] }
  0x4f   :  { %579 = vmatpush3.bf16.msra.mxu1 %v578_v15  ;;  %v90_v23 = vld [vmem:[#allocation5 + $0x48] sm:$0xff]  ;;  %v584_v24 = vpack.c.bf16 %v180_v20, %v179_v19  ;;  %v182_v26 = vld [vmem:[#allocation7 + $0x38] sm:$0xff]  ;;  %v91_v28 = vld [vmem:[#allocation5 + $0x50] sm:$0xff] }
  0x50   :  { %580 = vmatprep.subr.bf16.mxu1 %v763_v0  ;;  %v566_v27 = vpack.c.bf16 %v90_v23, %v89_v22  ;;  %v92_v29 = vld [vmem:[#allocation5 + $0x58] sm:$0xff]  ;;  %v587_v30 = vpack.c.bf16 %v182_v26, %v181_v25  ;;  %v183_v31 = vld [vmem:[#allocation7 + $0x40] sm:$0xff]  ;;  %v184_v32 = vld [vmem:[#allocation7 + $0x48] sm:$0xff] }
  0x51   :  { %558 = vmatpush3.bf16.msra.mxu0 %v557_v7  ;;  %v569_v33 = vpack.c.bf16 %v92_v29, %v91_v28  ;;  %v93_v34 = vld [vmem:[#allocation5 + $0x60] sm:$0xff]  ;;  %v94_v35 = vld [vmem:[#allocation5 + $0x68] sm:$0xff]  ;;  %v590_v36 = vpack.c.bf16 %v184_v32, %v183_v31  ;;  %v185_v37 = vld [vmem:[#allocation7 + $0x50] sm:$0xff] }
  0x52   :  { %559 = vmatprep.subr.bf16.mxu0 %v763_v0  ;;  %v186_v38 = vld [vmem:[#allocation7 + $0x58] sm:$0xff]  ;;  %v572_v39 = vpack.c.bf16 %v94_v35, %v93_v34  ;;  %v95_v40 = vld [vmem:[#allocation5 + $0x70] sm:$0xff]  ;;  %v187_v43 = vld [vmem:[#allocation7 + $0x60] sm:$0xff] }
  0x53   :  { %582 = vmatpush3.bf16.msra.mxu1 %v581_v18  ;;  %v96_v41 = vld [vmem:[#allocation5 + $0x78] sm:$0xff]  ;;  %v593_v42 = vpack.c.bf16 %v186_v38, %v185_v37  ;;  %v188_v44 = vld [vmem:[#allocation7 + $0x68] sm:$0xff]  ;;  %v189_v48 = vld [vmem:[#allocation7 + $0x70] sm:$0xff] }
  0x54   :  { %583 = vmatprep.subr.bf16.mxu1 %v763_v0  ;;  %v575_v45 = vpack.c.bf16 %v96_v41, %v95_v40  ;;  %v596_v46 = vpack.c.bf16 %v188_v44, %v187_v43  ;;  %v80_v47 = vld [vmem:[#allocation2] sm:$0xff]  ;;  %v269_v51 = vld [vmem:[#allocation8] sm:$0xff]  ;;  %v270_v52 = vld [vmem:[#allocation8 + $0x8] sm:$0xff] }
  0x55   :  { %561 = vmatpush3.bf16.msra.mxu0 %v560_v14  ;;  %v190_v49 = vld [vmem:[#allocation7 + $0x78] sm:$0xff]  ;;  %v271_v53 = vld [vmem:[#allocation8 + $0x10] sm:$0xff]  ;;  %v602_v54 = vpack.c.bf16 %v270_v52, %v269_v51  ;;  %v273_v57 = vld [vmem:[#allocation8 + $0x20] sm:$0xff] }
  0x56   :  { %562 = vmatprep.subr.bf16.mxu0 %v763_v0  ;;  %v599_v50 = vpack.c.bf16 %v190_v49, %v189_v48  ;;  %v272_v55 = vld [vmem:[#allocation8 + $0x18] sm:$0xff]  ;;  %v274_v58 = vld [vmem:[#allocation8 + $0x28] sm:$0xff]  ;;  %v275_v60 = vld [vmem:[#allocation8 + $0x30] sm:$0xff] }
  0x57   :  { %585 = vmatpush3.bf16.msra.mxu1 %v584_v24  ;;  %v605_v56 = vpack.c.bf16 %v272_v55, %v271_v53  ;;  %v608_v59 = vpack.c.bf16 %v274_v58, %v273_v57  ;;  %v276_v61 = vld [vmem:[#allocation8 + $0x38] sm:$0xff]  ;;  %v277_v63 = vld [vmem:[#allocation8 + $0x40] sm:$0xff]  ;;  %v279_v3 = vld [vmem:[#allocation8 + $0x50] sm:$0xff] }
  0x58   :  { %586 = vmatprep.subr.bf16.mxu1 %v763_v0  ;;  %v611_v62 = vpack.c.bf16 %v276_v61, %v275_v60  ;;  %v280_v4 = vld [vmem:[#allocation8 + $0x58] sm:$0xff]  ;;  %v281_v6 = vld [vmem:[#allocation8 + $0x60] sm:$0xff]  ;;  %v282_v7 = vld [vmem:[#allocation8 + $0x68] sm:$0xff] }
  0x59   :  { %564 = vmatpush3.bf16.msra.mxu0 %v563_v21  ;;  %v617_v5 = vpack.c.bf16 %v280_v4, %v279_v3  ;;  %v620_v8 = vpack.c.bf16 %v282_v7, %v281_v6  ;;  %v394_v9 = vld [vmem:[%s917_s2] ss:$0 sm:$0xff]  ;;  %v283_v14 = vld [vmem:[#allocation8 + $0x70] sm:$0xff]  ;;  %v362_v21 = vlaneseq }
  0x5a   :  { %565 = vmatprep.subr.bf16.mxu0 %v763_v0  ;;  %v284_v15 = vld [vmem:[#allocation8 + $0x78] sm:$0xff] }
  0x5b   :  { %588 = vmatpush3.bf16.msra.mxu1 %v587_v30  ;;  %v623_v16 = vpack.c.bf16 %v284_v15, %v283_v14  ;;  %v395_v17 = vld [vmem:[%s919_s4] ss:$0 sm:$0xff]  ;;  %v363_v22 = vand.u32 127, %v362_v21  ;;  %s766_s4 = smov [#allocation10]  }
  0x5c   :  { %589 = vmatprep.subr.bf16.mxu1 %v763_v0  ;;  %v396_v23 = vld [vmem:[%s921_s6] ss:$0 sm:$0xff]  ;;  %s383_s28 = sshll.u32 %s766_s4, 4  ;;  %s384_s28 = int_to_ptr.vmem [resolvable:$true] %s383_s28 }
  0x5d   :  { %567 = vmatpush3.bf16.msra.mxu0 %v566_v27  ;;  %vm364_vm1 = vcmp.lt.s32.totalorder %v363_v22, 16  ;;  %s727_s6 = scalar_lea.vmem %s384_s28, 128  ;;  %p732_p5 = scmp.lt.s32.totalorder %s384_s28, %s384_s28 }
  0x5e   :  { %568 = vmatprep.subr.bf16.mxu0 %v763_v0  ;;  %p728_p4 = scmp.ne.s32.totalorder %s384_s28, %s727_s6  ;;  %p733_p6 = scmp.lt.s32.totalorder %s727_s6, %s727_s6 }
  0x5f   :  { %591 = vmatpush3.bf16.msra.mxu1 %v590_v36 }
  0x60   :  { %592 = vmatprep.subr.bf16.mxu1 %v763_v0  ;;  %p734_p7 = por %p733_p6, %p732_p5 }
  0x61   :  { %570 = vmatpush3.bf16.msra.mxu0 %v569_v33 }
  0x62   :  { %571 = vmatprep.subr.bf16.mxu0 %v763_v0  ;;  %p735_p8 = pnand %p734_p7, %p728_p4 }
  0x63   :  { %594 = vmatpush3.bf16.msra.mxu1 %v593_v42 }
  0x64   :  { %595 = vmatprep.subr.bf16.mxu1 %v763_v0 }
  0x65   :  { %573 = vmatpush3.bf16.msra.mxu0 %v572_v39 }
  0x66   :  { %574 = vmatprep.subr.bf16.mxu0 %v763_v0 }
  0x67   :  { %597 = vmatpush3.bf16.msra.mxu1 %v596_v46 }
  0x68   :  { %598 = vmatprep.subr.bf16.mxu1 %v763_v0 }
  0x69   :  { %576 = vmatpush3.bf16.msra.mxu0 %v575_v45 }
  0x6a   :  { %601 = vmatprep.subr.bf16.mxu0 %v763_v0 }
  0x6b   :  { %600 = vmatpush3.bf16.msra.mxu1 %v599_v50 }
  0x6c   :  { %481 = vmatmul.mubr.f32.vlgmr.msra.gmra.mrb[0].mxu0 %v80_v47 }
  0x6d   :  { %550 = vmatprep.mubr.msk.f32.mxu0 %vm764_vm0, %v765_v1  ;;  %603 = vmatpush3.bf16.msra.mxu0 %v602_v54  ;;  %v278_v1 = vld [vmem:[#allocation8 + $0x48] sm:$0xff] }
  0x6e   :  { %604 = vmatprep.subr.bf16.mxu0 %v763_v0  ;;  %v614_v2 = vpack.c.bf16 %v278_v1, %v277_v63 }
  0x71   :  { %606 = vmatpush3.bf16.msra.mxu0 %v605_v56 }
  0x72   :  { %607 = vmatprep.subr.bf16.mxu0 %v763_v0 }
  0x75   :  { %609 = vmatpush3.bf16.msra.mxu0 %v608_v59 }
  0x76   :  { %610 = vmatprep.subr.bf16.mxu0 %v763_v0 }
  0x79   :  { %612 = vmatpush3.bf16.msra.mxu0 %v611_v62 }
  0x7a   :  { %613 = vmatprep.subr.bf16.mxu0 %v763_v0 }
  0x7d   :  { %615 = vmatpush3.bf16.msra.mxu0 %v614_v2 }
  0x7e   :  { %616 = vmatprep.subr.bf16.mxu0 %v763_v0 }
  0x81   :  { %618 = vmatpush3.bf16.msra.mxu0 %v617_v5 }
  0x82   :  { %619 = vmatprep.subr.bf16.mxu0 %v763_v0 }
  0x85   :  { %621 = vmatpush3.bf16.msra.mxu0 %v620_v8 }
  0x86   :  { %622 = vmatprep.subr.bf16.mxu0 %v763_v0 }
  0x89   :  { %624 = vmatpush3.bf16.msra.mxu0 %v623_v16 }
 0x13f   :  { %v170_v10 = vpop.f32.mrb[0].mxu0 }
 0x140   :  { %v171_v11 = vadd.f32 %v394_v9, %v170_v10  ;;  %v482_v12 = vpop.f32.mrb[1].mxu0 }
 0x142   :  { %v174_v13 = vmax.f32 %v171_v11, 0.0 }
 0x144   :  { %516 = vmatmul.mubr.f32.vlgmr.msra.gmra.mrb[0].mxu1 %v174_v13 }
 0x217   :  { %v264_v18 = vpop.f32.mrb[0].mxu1 }
 0x218   :  { %v265_v19 = vadd.f32 %v395_v17, %v264_v18  ;;  %v517_v0 = vpop.f32.mrb[1].mxu1 }
 0x21a   :  { %v268_v20 = vmax.f32 %v265_v19, 0.0 }
 0x21c   :  { %551 = vmatmul.mubr.f32.vlgmr.msra.gmra.mrb[2].mxu0 %v268_v20 }
 0x2ef   :  { %v358_v24 = vpop.f32.mrb[2].mxu0 }
 0x2f0   :  { %v359_v25 = vadd.f32 %v396_v23, %v358_v24  ;;  %v552_v26 = vpop.f32.mrb[3].mxu0 }
 0x2f2   :  { %v365_v27 = vsel %vm364_vm1, %v359_v25, -1e+30 }
 0x2f3   :  { %366 = vmax.xlane.f32.xlu0 %v365_v27 }
 0x380   :  { %v367_v28 = vpop.xlane.xlu0 %366 }
 0x381   :  { %v368_v29 = vsub.f32 %v365_v27, %v367_v28 }
 0x383   :  { %v369_v30 = vmul.f32 1.442695, %v368_v29 }
 0x385   :  { %635 = vpow2.f32 %v369_v30 }
 0x38f   :  { %v636_v31 = vpop.eup %635 }
 0x390   :  { %371 = vadd.xlane.f32.xlu0 %v636_v31 }
 0x41d   :  { %v372_v32 = vpop.xlane.xlu0 %371 }
 0x41e   :  { %637 = vlog2.f32 %v372_v32 }
 0x428   :  { %v638_v33 = vpop.eup %637 }
 0x429   :  { %v374_v34 = vmul.f32 0.6931472, %v638_v33 }
 0x42b   :  { %v375_v35 = vsub.f32 %v368_v29, %v374_v34 }
 0x42d   :  { %376 = vst [vmem:[#allocation10] sm:$0xff] %v375_v35 }
 0x42e   :  { %738 = shalt.err (!%p735_p8)
}
 0x42f   :  { %s739_s8 = scalar_lea.hbm %s922_s7, 128 }
 0x430   :  { %p740_p9 = scmp.ne.s32.totalorder %s922_s7, %s739_s8  ;;  %p743_p10 = scmp.lt.u32.totalorder %s739_s8, %s922_s7 }
 0x432   :  { %p745_p11 = pnand %p743_p10, %p740_p9 }
 0x434   :  { %748 = shalt.err (!%p745_p11)
}
 0x435   :  { %386 = dma.vmem_to_hbm [thread:$0]  %s384_s28, 128, %s922_s7, [#allocation4]  }
 0x436   :  { %755 = dma.done.wait [#allocation4], 128  }
 0x437   :  { %756 = vsyncadd [#allocation4], 4294967168 }
 0x438   :  { %390 = vsyncpa [#allocation3], 1 }
 0x439   :  { %391 = vsyncpa [#allocation6], 1 }
 0x43a   :  { %392 = vsyncpa [#allocation9], 1 }
 0x43b   :  { %393 = vsyncpa [#allocation4], 1 }

</bundles_post_ra>
